<compile_context>
chip_gen: v7x
topology: tpu7x:2x2x1
jax: 0.10.0
libtpu: 0.0.40
codegen_flags: <defaults>
</compile_context>

<pallas_src>
import functools
import math

import jax
import jax.numpy as jnp
from jax.experimental import pallas as pl
from jax.experimental.pallas import tpu as pltpu

_LANE = 128


def _ceil_to(a, m):
    return -(-a // m) * m


# --------------------------------------------------------------------------- #
# Kernels
# --------------------------------------------------------------------------- #
def _layernorm_kernel(x_ref, w_ref, b_ref, o_ref, *, eps):
    """Standard path: normalize each row of a (row_tile, D) block over D."""
    x = x_ref[...].astype(jnp.float32)
    # One-pass statistics in f32: a single read of x feeds both reductions.
    mean = jnp.mean(x, axis=-1, keepdims=True)
    ex2 = jnp.mean(x * x, axis=-1, keepdims=True)
    # Clamp guards E[x^2] - mean^2 rounding (constant rows with large magnitude).
    var = jnp.maximum(ex2 - mean * mean, 0.0)
    inv = jax.lax.rsqrt(var + eps)
    w = w_ref[...].astype(jnp.float32)
    b = b_ref[...].astype(jnp.float32)
    scale = inv * w
    o_ref[...] = (x * scale + (b - mean * scale)).astype(o_ref.dtype)


def _layernorm_folded_kernel(x_ref, w_ref, b_ref, m_ref, o_ref, *, eps, inv_d):
    """Small-D path: g = 128 // D original rows folded into the 128-lane axis.

    m (128, 128) bf16: block-diagonal 0/1 matrix, m[l, l'] = 1 iff l//D == l'//D.
    `v @ m` therefore gives every lane its own segment's sum (reduce + broadcast
    fused in one matmul).  The f32 operand is split into exact bf16 hi/lo halves
    so the MXU only runs single-pass bf16 matmuls (the 0/1 matrix is exact in
    bf16) instead of 6-pass f32 HIGHEST matmuls, at ~1e-5 relative accuracy.
    """
    x = x_ref[...].astype(jnp.float32)      # (rt, 128)
    m = m_ref[...]                          # (128, 128) bf16

    def seg_sum(v):
        hi = v.astype(jnp.bfloat16)
        lo = (v - hi.astype(jnp.float32)).astype(jnp.bfloat16)
        return (jnp.dot(hi, m, preferred_element_type=jnp.float32)
                + jnp.dot(lo, m, preferred_element_type=jnp.float32))

    mean = seg_sum(x) * inv_d               # per-segment mean, broadcast on lanes
    ex2 = seg_sum(x * x) * inv_d
    var = jnp.maximum(ex2 - mean * mean, 0.0)
    inv = jax.lax.rsqrt(var + eps)
    w = w_ref[...].astype(jnp.float32)      # (1, 128) tiled weight
    b = b_ref[...].astype(jnp.float32)      # (1, 128) tiled bias
    scale = inv * w
    o_ref[...] = (x * scale + (b - mean * scale)).astype(o_ref.dtype)


# --------------------------------------------------------------------------- #
# Tiling / VMEM heuristics (generation-aware)
# --------------------------------------------------------------------------- #
def _vmem_capacity_bytes():
    try:
        cap = getattr(pltpu.get_tpu_info(), "vmem_capacity_bytes", None)
        if cap:
            return int(cap)
    except Exception:
        pass
    # Conservative fallback = v7x per-TC VMEM; safe on every generation.
    return 64 * 1024 * 1024


def _choose_tiling(rows, d_block, itemsize, row_tile=None):
    """Pick a dtype/generation-aware row tile and an explicit scoped-VMEM limit."""
    # Sublane packing granularity: 8 for 32-bit, 16 for 16-bit, 32 for 8-bit dtypes.
    if itemsize >= 4:
        gran = 8
    elif itemsize == 2:
        gran = 16
    else:
        gran = 32

    capacity = _vmem_capacity_bytes()
    budget = capacity // 2            # ~64 MiB on v5e/v6e (128 MiB VMEM), ~32 MiB on v7x
    cap = (capacity * 3) // 4         # never ask Mosaic for more than ~3/4 of physical

    if row_tile is None:
        # Big tiles amortize the ~0.35 us per-grid-step overhead; 128 MiB parts
        # get a larger target than 64 MiB parts.
        row_tile = 2048 if capacity >= (96 << 20) else 1024

    # Per-row VMEM cost: double-buffered input + output blocks plus ~6 fp32 temps.
    per_row = d_block * (4 * itemsize + 24)
    max_rows = max(gran, (budget // per_row) // gran * gran)
    rt = max(gran, min(row_tile, max_rows) // gran * gran)

    if rows <= rt:
        # Single block: use exact rows when tiny (block dim == full array dim is
        # always legal); otherwise round up to the sublane granularity and let
        # Pallas mask the ragged tail.
        rt = rows if rows <= gran else min(rt, _ceil_to(rows, gran))

    # Guarantee >=2 grid steps whenever rows allow: shards the "parallel" axis
    # across both TensorCores on v7x and lets the auto-pipeline overlap DMA with
    # compute even on single-TC parts.
    if rows > gran and rt >= rows:
        rt = max(gran, _ceil_to(-(-rows // 2), gran))

    needed = rt * per_row + 16 * d_block * (itemsize + 4) + (4 << 20)
    vmem_limit = int(min(cap, max(32 << 20, needed)))
    return rt, vmem_limit


# --------------------------------------------------------------------------- #
# Wrapper
# --------------------------------------------------------------------------- #
def layer_norm_pallas(x, weight=None, bias=None, *, eps=1e-5, row_tile=None):
    """Equivalent of F.layer_norm(x, (D,), weight, bias, eps) over the last axis."""
    # TODO(synk): multi-dim normalized_shape would flatten the trailing dims here;
    # the vallex module always uses a single hidden dim.
    orig_shape = x.shape
    D = orig_shape[-1]
    rows = math.prod(orig_shape[:-1]) if len(orig_shape) > 1 else 1

    if weight is None:
        weight = jnp.ones((D,), dtype=x.dtype)
    if bias is None:
        bias = jnp.zeros((D,), dtype=x.dtype)

    itemsize = jnp.dtype(x.dtype).itemsize

    # ---------------- small-D lane-dense folded path ---------------- #
    # TODO(synk): D < 128 with 128 % D != 0 still takes the standard path and pays
    # masked sub-128-lane stores; vallex never uses such widths.
    if D < _LANE and _LANE % D == 0:
        g = _LANE // D
        rows_pad = _ceil_to(rows, g)
        x2 = x.reshape(rows, D)
        if rows_pad != rows:
            # Tiny wrapper-side pad keeps every HBM store lane-dense (no vst.msk).
            x2 = jnp.pad(x2, ((0, rows_pad - rows), (0, 0)))
        rows_f = rows_pad // g
        Db = _LANE
        x2 = x2.reshape(rows_f, Db)
        w2 = jnp.tile(weight.reshape(-1), g).reshape(1, Db)
        b2 = jnp.tile(bias.reshape(-1), g).reshape(1, Db)
        # Block-diagonal 0/1 segment matrix (exact in bf16): reduce + broadcast in one matmul.
        lane = jnp.arange(Db)
        m = (lane[:, None] // D == lane[None, :] // D).astype(jnp.bfloat16)

        rt, vmem_limit = _choose_tiling(rows_f, Db, itemsize, row_tile)
        grid = (pl.cdiv(rows_f, rt),)

        out = pl.pallas_call(
            functools.partial(_layernorm_folded_kernel, eps=eps, inv_d=1.0 / D),
            out_shape=jax.ShapeDtypeStruct((rows_f, Db), x.dtype),
            grid_spec=pltpu.PrefetchScalarGridSpec(
                num_scalar_prefetch=0,
                grid=grid,
                in_specs=[
                    pl.BlockSpec((rt, Db), lambda i: (i, 0)),
                    pl.BlockSpec((1, Db), lambda i: (0, 0)),
                    pl.BlockSpec((1, Db), lambda i: (0, 0)),
                    pl.BlockSpec((Db, Db), lambda i: (0, 0)),
                ],
                out_specs=pl.BlockSpec((rt, Db), lambda i: (i, 0)),
            ),
            compiler_params=pltpu.CompilerParams(
                dimension_semantics=("parallel",),
                vmem_limit_bytes=vmem_limit,
            ),
        )(x2, w2, b2, m)
        out = out.reshape(rows_pad, D)
        if rows_pad != rows:
            out = out[:rows]
        return out.reshape(orig_shape)

    # ---------------- standard path (D is the full last dim) ---------------- #
    x2 = x.reshape(rows, D)
    w2 = weight.reshape(1, D)
    b2 = bias.reshape(1, D)

    rt, vmem_limit = _choose_tiling(rows, D, itemsize, row_tile)
    grid = (pl.cdiv(rows, rt),)   # ragged tail handled by Pallas (no jnp.pad copy)

    out = pl.pallas_call(
        functools.partial(_layernorm_kernel, eps=eps),
        out_shape=jax.ShapeDtypeStruct((rows, D), x.dtype),
        grid_spec=pltpu.PrefetchScalarGridSpec(
            num_scalar_prefetch=0,
            grid=grid,
            in_specs=[
                pl.BlockSpec((rt, D), lambda i: (i, 0)),
                pl.BlockSpec((1, D), lambda i: (0, 0)),
                pl.BlockSpec((1, D), lambda i: (0, 0)),
            ],
            out_specs=pl.BlockSpec((rt, D), lambda i: (i, 0)),
        ),
        compiler_params=pltpu.CompilerParams(
            dimension_semantics=("parallel",),
            vmem_limit_bytes=vmem_limit,
        ),
    )(x2, w2, b2)
    return out.reshape(orig_shape)


def layer_norm_forward(inp, weight, bias, *, eps=1e-5):
    """Mirrors LayerNorm.forward: accepts either a tensor or an (input, embedding) tuple."""
    if isinstance(inp, tuple):
        x, embedding = inp
        return layer_norm_pallas(x, weight, bias, eps=eps), embedding
    return layer_norm_pallas(inp, weight, bias, eps=eps)


# --------------------------------------------------------------------------- #
# Demo / correctness check
# --------------------------------------------------------------------------- #
if __name__ == "__main__":
    def ref_ln(x, w, b, eps):
        mean = jnp.mean(x, axis=-1, keepdims=True)
        var = jnp.mean((x - mean) ** 2, axis=-1, keepdims=True)
        return (x - mean) / jnp.sqrt(var + eps) * w + b

    eps = 1e-5

    # Module-consistent small shape (hits the lane-dense folded path, D=32 < 128).
    batch, seq, hidden = 2, 8, 32
    key = jax.random.PRNGKey(0)
    x = jax.random.normal(key, (batch, seq, hidden), dtype=jnp.float32)
    weight = jnp.ones((hidden,), dtype=jnp.float32)   # reset_parameters(): ones
    bias = jnp.zeros((hidden,), dtype=jnp.float32)    # reset_parameters(): zeros

    y = jax.block_until_ready(layer_norm_pallas(x, weight, bias, eps=eps))
    ref = ref_ln(x, weight, bias, eps)
    assert y.shape == x.shape
    assert jnp.allclose(y, ref, atol=1e-4, rtol=1e-4), "mismatch vs reference (folded path)"

    # Folded path with a rows % g != 0 tail (exercises the wrapper-side row pad).
    x3 = jax.random.normal(jax.random.PRNGKey(4), (2, 9, hidden), dtype=jnp.float32)
    w3 = jax.random.normal(jax.random.PRNGKey(5), (hidden,), dtype=jnp.float32)
    b3 = jax.random.normal(jax.random.PRNGKey(6), (hidden,), dtype=jnp.float32)
    y3 = jax.block_until_ready(layer_norm_pallas(x3, w3, b3, eps=eps))
    ref3 = ref_ln(x3, w3, b3, eps)
    assert jnp.allclose(y3, ref3, atol=1e-4, rtol=1e-4), "mismatch vs reference (folded+pad path)"

    # Standard path with a ragged row tail (rows=21, split into >=2 grid steps).
    b2_, s2_, h2_ = 3, 7, 256
    x2 = jax.random.normal(jax.random.PRNGKey(1), (b2_, s2_, h2_), dtype=jnp.float32)
    w2 = jax.random.normal(jax.random.PRNGKey(2), (h2_,), dtype=jnp.float32)
    bb2 = jax.random.normal(jax.random.PRNGKey(3), (h2_,), dtype=jnp.float32)
    y2 = jax.block_until_ready(layer_norm_pallas(x2, w2, bb2, eps=eps))
    ref2 = ref_ln(x2, w2, bb2, eps)
    assert jnp.allclose(y2, ref2, atol=1e-4, rtol=1e-4), "mismatch vs reference (standard path)"

    print("KERNEL_OK")
</pallas_src>

<mosaic_0001>
module attributes {stable_mosaic.version = 11 : i64} {
  func.func @_layernorm_folded_kernel(%arg0: i32, %arg1: memref<4x128xf32, #tpu.memory_space<vmem>>, %arg2: memref<1x128xf32, #tpu.memory_space<vmem>>, %arg3: memref<1x128xf32, #tpu.memory_space<vmem>>, %arg4: memref<128x128xbf16, #tpu.memory_space<vmem>>, %arg5: memref<4x128xf32, #tpu.memory_space<vmem>>) attributes {dimension_semantics = [#tpu.dimension_semantics<parallel>], iteration_bounds = array<i64: 1>, scalar_prefetch = 0 : i64, scratch_operands = 0 : i64, tpu.core_type = #tpu.core_type<tc>, window_params = [{transform_indices = @transform_0, window_bounds = array<i64: 4, 128>}, {pipeline_mode = #tpu.pipeline_mode<synchronous>, transform_indices = @transform_1, window_bounds = array<i64: 1, 128>}, {pipeline_mode = #tpu.pipeline_mode<synchronous>, transform_indices = @transform_2, window_bounds = array<i64: 1, 128>}, {pipeline_mode = #tpu.pipeline_mode<synchronous>, transform_indices = @transform_3, window_bounds = array<i64: 128, 128>}, {transform_indices = @transform_4, window_bounds = array<i64: 4, 128>}]} {
    %c0 = arith.constant 0 : index
    %c0_0 = arith.constant 0 : index
    %0 = vector.load %arg1[%c0, %c0_0] : memref<4x128xf32, #tpu.memory_space<vmem>>, vector<4x128xf32>
    %c0_1 = arith.constant 0 : index
    %c0_2 = arith.constant 0 : index
    %1 = vector.load %arg4[%c0_1, %c0_2] : memref<128x128xbf16, #tpu.memory_space<vmem>>, vector<128x128xbf16>
    %2 = arith.truncf %0 : vector<4x128xf32> to vector<4x128xbf16>
    %3 = arith.extf %2 : vector<4x128xbf16> to vector<4x128xf32>
    %4 = arith.subf %0, %3 : vector<4x128xf32>
    %5 = arith.truncf %4 : vector<4x128xf32> to vector<4x128xbf16>
    %cst = arith.constant dense<0.000000e+00> : vector<4x128xf32>
    %6 = tpu.matmul %2, %1, %cst {dimension_numbers = #tpu.dot_dimension_numbers<[1], [0], [0], [1], [0, 0, 1, 1], [], []>} : vector<4x128xbf16>, vector<128x128xbf16>, vector<4x128xf32> -> vector<4x128xf32>
    %cst_3 = arith.constant dense<0.000000e+00> : vector<4x128xf32>
    %7 = tpu.matmul %5, %1, %cst_3 {dimension_numbers = #tpu.dot_dimension_numbers<[1], [0], [0], [1], [0, 0, 1, 1], [], []>} : vector<4x128xbf16>, vector<128x128xbf16>, vector<4x128xf32> -> vector<4x128xf32>
    %8 = arith.addf %6, %7 : vector<4x128xf32>
    %cst_4 = arith.constant 3.125000e-02 : f32
    %9 = vector.broadcast %cst_4 : f32 to vector<4x128xf32>
    %10 = arith.mulf %8, %9 : vector<4x128xf32>
    %11 = arith.mulf %0, %0 : vector<4x128xf32>
    %12 = arith.truncf %11 : vector<4x128xf32> to vector<4x128xbf16>
    %13 = arith.extf %12 : vector<4x128xbf16> to vector<4x128xf32>
    %14 = arith.subf %11, %13 : vector<4x128xf32>
    %15 = arith.truncf %14 : vector<4x128xf32> to vector<4x128xbf16>
    %cst_5 = arith.constant dense<0.000000e+00> : vector<4x128xf32>
    %16 = tpu.matmul %12, %1, %cst_5 {dimension_numbers = #tpu.dot_dimension_numbers<[1], [0], [0], [1], [0, 0, 1, 1], [], []>} : vector<4x128xbf16>, vector<128x128xbf16>, vector<4x128xf32> -> vector<4x128xf32>
    %cst_6 = arith.constant dense<0.000000e+00> : vector<4x128xf32>
    %17 = tpu.matmul %15, %1, %cst_6 {dimension_numbers = #tpu.dot_dimension_numbers<[1], [0], [0], [1], [0, 0, 1, 1], [], []>} : vector<4x128xbf16>, vector<128x128xbf16>, vector<4x128xf32> -> vector<4x128xf32>
    %18 = arith.addf %16, %17 : vector<4x128xf32>
    %cst_7 = arith.constant 3.125000e-02 : f32
    %19 = vector.broadcast %cst_7 : f32 to vector<4x128xf32>
    %20 = arith.mulf %18, %19 : vector<4x128xf32>
    %21 = arith.mulf %10, %10 : vector<4x128xf32>
    %22 = arith.subf %20, %21 : vector<4x128xf32>
    %cst_8 = arith.constant 0.000000e+00 : f32
    %23 = vector.broadcast %cst_8 : f32 to vector<4x128xf32>
    %24 = arith.maximumf %22, %23 : vector<4x128xf32>
    %cst_9 = arith.constant 9.99999974E-6 : f32
    %25 = vector.broadcast %cst_9 : f32 to vector<4x128xf32>
    %26 = arith.addf %24, %25 : vector<4x128xf32>
    %27 = math.rsqrt %26 : vector<4x128xf32>
    %c0_10 = arith.constant 0 : index
    %c0_11 = arith.constant 0 : index
    %28 = vector.load %arg2[%c0_10, %c0_11] : memref<1x128xf32, #tpu.memory_space<vmem>>, vector<1x128xf32>
    %c0_12 = arith.constant 0 : index
    %c0_13 = arith.constant 0 : index
    %29 = vector.load %arg3[%c0_12, %c0_13] : memref<1x128xf32, #tpu.memory_space<vmem>>, vector<1x128xf32>
    %30 = vector.broadcast %28 : vector<1x128xf32> to vector<4x128xf32>
    %31 = arith.mulf %27, %30 : vector<4x128xf32>
    %32 = arith.mulf %0, %31 : vector<4x128xf32>
    %33 = arith.mulf %10, %31 : vector<4x128xf32>
    %34 = vector.broadcast %29 : vector<1x128xf32> to vector<4x128xf32>
    %35 = arith.subf %34, %33 : vector<4x128xf32>
    %36 = arith.addf %32, %35 : vector<4x128xf32>
    %c0_14 = arith.constant 0 : index
    %c0_15 = arith.constant 0 : index
    %37 = vector.load %arg5[%c0_14, %c0_15] : memref<4x128xf32, #tpu.memory_space<vmem>>, vector<4x128xf32>
    tpu.vector_store %arg5[%c0_14, %c0_15], %36 {strides = array<i32>} : memref<4x128xf32, #tpu.memory_space<vmem>>, vector<4x128xf32>,
    return
  }
  func.func @transform_0(%arg0: i32) -> (i32, i32) {
    %c0_i32 = arith.constant 0 : i32
    %c0_i32_0 = arith.constant 0 : i32
    return %arg0, %c0_i32 : i32, i32
  }
  func.func @transform_1(%arg0: i32) -> (i32, i32) {
    %c0_i32 = arith.constant 0 : i32
    %c0_i32_0 = arith.constant 0 : i32
    %c0_i32_1 = arith.constant 0 : i32
    return %c0_i32, %c0_i32_0 : i32, i32
  }
  func.func @transform_2(%arg0: i32) -> (i32, i32) {
    %c0_i32 = arith.constant 0 : i32
    %c0_i32_0 = arith.constant 0 : i32
    %c0_i32_1 = arith.constant 0 : i32
    return %c0_i32, %c0_i32_0 : i32, i32
  }
  func.func @transform_3(%arg0: i32) -> (i32, i32) {
    %c0_i32 = arith.constant 0 : i32
    %c0_i32_0 = arith.constant 0 : i32
    %c0_i32_1 = arith.constant 0 : i32
    return %c0_i32, %c0_i32_0 : i32, i32
  }
  func.func @transform_4(%arg0: i32) -> (i32, i32) {
    %c0_i32 = arith.constant 0 : i32
    %c0_i32_0 = arith.constant 0 : i32
    return %arg0, %c0_i32 : i32, i32
  }
}

</mosaic_0001>

<bundles_post_ra>
// kernel: tpu_custom_call.1
= control target key start
LH: loop header
LB: loop body
LE: loop exit
PB: predicated region body
PF: predicated region fallthrough
CT: control target
= control target key end

     0   :  { %9 = vsyncpa [#allocation3], 0  ;;  %s674_s0 = inlined_call_operand.hbm [shape: f32[4,128], index: 0, kind: input, shape index: {}]   ;;  %s675_s1 = inlined_call_operand.vmem [shape: f32[1,128], index: 1, kind: input, shape index: {}]   ;;  %s676_s2 = inlined_call_operand.vmem [shape: f32[1,128], index: 2, kind: input, shape index: {}]   ;;  %s677_s3 = inlined_call_operand.hbm [shape: bf16[128,128], index: 3, kind: input, shape index: {}]   ;;  %s678_s4 = inlined_call_operand.hbm [shape: f32[4,128], index: 4, kind: output, shape index: {}]  }
   0x1   :  { %10 = vsyncpa [#allocation6], 0 }
   0x2   :  { %11 = vsyncpa [#allocation4], 0  ;;  %s545_s15 = smov [#allocation2]   ;;  %s546_s17 = smov [#allocation5]  }
   0x3   :  { %s18_s16 = sshll.u32 %s545_s15, 4  ;;  %s31_s18 = sshll.u32 %s546_s17, 4  ;;  %s19_s16 = int_to_ptr.vmem [resolvable:$true] %s18_s16  ;;  %s577_s18 = int_to_ptr.vmem [resolvable:$true] %s31_s18 }
   0x4   :  { %s473_s21 = scalar_lea.hbm %s674_s0, 64 }
   0x5   :  { %p474_p0 = scmp.ne.s32.totalorder %s674_s0, %s473_s21  ;;  %p477_p1 = scmp.lt.u32.totalorder %s473_s21, %s674_s0 }
   0x7   :  { %p479_p2 = pnand %p477_p1, %p474_p0 }
   0x9   :  { %482 = shalt.err (!%p479_p2)
}
   0xa   :  { %s483_s26 = scalar_lea.vmem %s19_s16, 64  ;;  %p488_p4 = scmp.lt.s32.totalorder %s19_s16, %s19_s16 }
   0xb   :  { %p484_p3 = scmp.ne.s32.totalorder %s19_s16, %s483_s26  ;;  %p489_p5 = scmp.lt.s32.totalorder %s483_s26, %s483_s26 }
   0xd   :  { %p490_p6 = por %p489_p5, %p488_p4 }
   0xf   :  { %p491_p7 = pnand %p490_p6, %p484_p3 }
  0x11   :  { %494 = shalt.err (!%p491_p7)
}
  0x12   :  { %21 = dma.hbm_to_vmem [thread:$0]  %s674_s0, 64, %s19_s16, [#allocation3]  }
  0x13   :  { %s495_s5 = scalar_lea.hbm %s677_s3, 1024 }
  0x14   :  { %p496_p8 = scmp.ne.s32.totalorder %s677_s3, %s495_s5  ;;  %p499_p9 = scmp.lt.u32.totalorder %s495_s5, %s677_s3 }
  0x16   :  { %p501_p10 = pnand %p499_p9, %p496_p8 }
  0x18   :  { %504 = shalt.err (!%p501_p10)
}
  0x19   :  { %s505_s10 = scalar_lea.vmem %s577_s18, 1024  ;;  %p510_p12 = scmp.lt.s32.totalorder %s577_s18, %s577_s18 }
  0x1a   :  { %p506_p11 = scmp.ne.s32.totalorder %s577_s18, %s505_s10  ;;  %p511_p13 = scmp.lt.s32.totalorder %s505_s10, %s505_s10 }
  0x1c   :  { %p512_p0 = por %p511_p13, %p510_p12 }
  0x1e   :  { %p513_p1 = pnand %p512_p0, %p506_p11 }
  0x20   :  { %516 = shalt.err (!%p513_p1)
}
  0x21   :  { %s547_s0 = smov 64   ;;  %s548_s11 = smov 4  }
  0x22   :  { %37 = dma.hbm_to_vmem [thread:$0]  %s677_s3, 1024, %s577_s18, [#allocation6], %s547_s0, %s547_s0, %s548_s11  }
  0x23   :  { %539 = dma.done.wait [#allocation3], 64  }
  0x24   :  { %540 = vsyncadd [#allocation3], 4294967232 }
  0x25   :  { %541 = dma.done.wait [#allocation6], 1024  }
  0x26   :  { %542 = vsyncadd [#allocation6], 4294966272  ;;  %v549_v0 = vmov 0.0   ;;  %vm550_vm0 = vmmov 0   ;;  %v463_v1 = vld [vmem:[#allocation5] sm:$0xff]   ;;  %v464_v2 = vld [vmem:[#allocation5 + $0x8] sm:$0xff]  }
  0x27   :  { %368 = vmatprep.subr.bf16.mxu0 %v549_v0  ;;  %408 = vmatprep.subr.bf16.mxu1 %v549_v0  ;;  %v465_v3 = vld [vmem:[#allocation5 + $0x10] sm:$0xff]   ;;  %v466_v4 = vld [vmem:[#allocation5 + $0x18] sm:$0xff]   ;;  %v467_v7 = vld [vmem:[#allocation5 + $0x20] sm:$0xff]   ;;  %s551_s17 = smov [#allocation7]  }
  0x28   :  { %384 = vmatprep.mubr.msk.bf16.mxu0 %vm550_vm0, %v549_v0  ;;  %424 = vmatprep.mubr.msk.bf16.mxu1 %vm550_vm0, %v549_v0  ;;  %v618_v5 = vld [vmem:[#allocation2] sm:$0xf]  ;;  %v468_v10 = vld [vmem:[#allocation5 + $0x28] sm:$0xff]   ;;  %v469_v13 = vld [vmem:[#allocation5 + $0x30] sm:$0xff]   ;;  %s312_s18 = sshll.u32 %s551_s17, 4  ;;  %s313_s18 = int_to_ptr.vmem [resolvable:$true] %s312_s18 }
  0x29   :  { %369 = vmatpush3.bf16.msra.mxu0 %v463_v1  ;;  %409 = vmatpush3.bf16.msra.mxu1 %v463_v1  ;;  %v195_v6 = vmul.f32 %v618_v5, %v618_v5  ;;  %v62_v8 = vpack.c.bf16 %v618_v5, %v618_v5  ;;  %v470_v16 = vld [vmem:[#allocation5 + $0x38] sm:$0xff]   ;;  %s517_s19 = scalar_lea.vmem %s313_s18, 64  ;;  %p522_p3 = scmp.lt.s32.totalorder %s313_s18, %s313_s18 }
  0x2a   :  { %370 = vmatprep.subr.bf16.mxu0 %v549_v0  ;;  %410 = vmatprep.subr.bf16.mxu1 %v549_v0  ;;  %v330_v33 = vld [vmem:[%s675_s1] ss:$0 sm:$0xff]  ;;  %p518_p2 = scmp.ne.s32.totalorder %s313_s18, %s517_s19  ;;  %p523_p4 = scmp.lt.s32.totalorder %s517_s19, %s517_s19 }
  0x2b   :  { %v196_v9 = vpack.c.bf16 %v195_v6, %v195_v6  ;;  %v63_v11 = vunpack.c.l.bf16 %v62_v8  ;;  %v331_v36 = vld [vmem:[%s676_s2] ss:$0 sm:$0xff] }
  0x2c   :  { %p524_p5 = por %p523_p4, %p522_p3 }
  0x2d   :  { %371 = vmatpush3.bf16.msra.mxu0 %v464_v2  ;;  %411 = vmatpush3.bf16.msra.mxu1 %v464_v2  ;;  %v197_v12 = vunpack.c.l.bf16 %v196_v9  ;;  %v64_v14 = vsub.f32 %v618_v5, %v63_v11 }
  0x2e   :  { %372 = vmatprep.subr.bf16.mxu0 %v549_v0  ;;  %412 = vmatprep.subr.bf16.mxu1 %v549_v0  ;;  %p525_p6 = pnand %p524_p5, %p518_p2 }
  0x2f   :  { %v198_v15 = vsub.f32 %v195_v6, %v197_v12  ;;  %v65_v17 = vpack.c.bf16 %v64_v14, %v64_v14 }
  0x31   :  { %373 = vmatpush3.bf16.msra.mxu0 %v465_v3  ;;  %413 = vmatpush3.bf16.msra.mxu1 %v465_v3  ;;  %v199_v18 = vpack.c.bf16 %v198_v15, %v198_v15 }
  0x32   :  { %374 = vmatprep.subr.bf16.mxu0 %v549_v0  ;;  %414 = vmatprep.subr.bf16.mxu1 %v549_v0 }
  0x35   :  { %375 = vmatpush3.bf16.msra.mxu0 %v466_v4  ;;  %415 = vmatpush3.bf16.msra.mxu1 %v466_v4 }
  0x36   :  { %376 = vmatprep.subr.bf16.mxu0 %v549_v0  ;;  %416 = vmatprep.subr.bf16.mxu1 %v549_v0 }
  0x39   :  { %377 = vmatpush3.bf16.msra.mxu0 %v467_v7  ;;  %417 = vmatpush3.bf16.msra.mxu1 %v467_v7 }
  0x3a   :  { %378 = vmatprep.subr.bf16.mxu0 %v549_v0  ;;  %418 = vmatprep.subr.bf16.mxu1 %v549_v0 }
  0x3d   :  { %379 = vmatpush3.bf16.msra.mxu0 %v468_v10  ;;  %419 = vmatpush3.bf16.msra.mxu1 %v468_v10 }
  0x3e   :  { %380 = vmatprep.subr.bf16.mxu0 %v549_v0  ;;  %420 = vmatprep.subr.bf16.mxu1 %v549_v0 }
  0x41   :  { %381 = vmatpush3.bf16.msra.mxu0 %v469_v13  ;;  %421 = vmatpush3.bf16.msra.mxu1 %v469_v13 }
  0x42   :  { %382 = vmatprep.subr.bf16.mxu0 %v549_v0  ;;  %422 = vmatprep.subr.bf16.mxu1 %v549_v0 }
  0x45   :  { %383 = vmatpush3.bf16.msra.mxu0 %v470_v16  ;;  %423 = vmatpush3.bf16.msra.mxu1 %v470_v16 }
  0x46   :  { %388 = vmatprep.subr.bf16.mxu0 %v549_v0  ;;  %428 = vmatprep.subr.bf16.mxu1 %v549_v0 }
  0x48   :  { %385 = vmatmul.mubr.bf16.vlgmr.msra.gmra.mrb[0].mxu0 %v65_v17  ;;  %425 = vmatmul.mubr.bf16.vlgmr.msra.gmra.mrb[0].mxu1 %v199_v18 }
  0x49   :  { %389 = vmatpush3.bf16.msra.mxu0 %v463_v1  ;;  %429 = vmatpush3.bf16.msra.mxu1 %v463_v1 }
  0x4a   :  { %390 = vmatprep.subr.bf16.mxu0 %v549_v0  ;;  %430 = vmatprep.subr.bf16.mxu1 %v549_v0 }
  0x4b   :  { %404 = vmatprep.mubr.msk.bf16.mxu0 %vm550_vm0, %v549_v0  ;;  %444 = vmatprep.mubr.msk.bf16.mxu1 %vm550_vm0, %v549_v0 }
  0x4d   :  { %391 = vmatpush3.bf16.msra.mxu0 %v464_v2  ;;  %431 = vmatpush3.bf16.msra.mxu1 %v464_v2 }
  0x4e   :  { %392 = vmatprep.subr.bf16.mxu0 %v549_v0  ;;  %432 = vmatprep.subr.bf16.mxu1 %v549_v0 }
  0x51   :  { %393 = vmatpush3.bf16.msra.mxu0 %v465_v3  ;;  %433 = vmatpush3.bf16.msra.mxu1 %v465_v3 }
  0x52   :  { %394 = vmatprep.subr.bf16.mxu0 %v549_v0  ;;  %434 = vmatprep.subr.bf16.mxu1 %v549_v0 }
  0x55   :  { %395 = vmatpush3.bf16.msra.mxu0 %v466_v4  ;;  %435 = vmatpush3.bf16.msra.mxu1 %v466_v4 }
  0x56   :  { %396 = vmatprep.subr.bf16.mxu0 %v549_v0  ;;  %436 = vmatprep.subr.bf16.mxu1 %v549_v0 }
  0x59   :  { %397 = vmatpush3.bf16.msra.mxu0 %v467_v7  ;;  %437 = vmatpush3.bf16.msra.mxu1 %v467_v7 }
  0x5a   :  { %398 = vmatprep.subr.bf16.mxu0 %v549_v0  ;;  %438 = vmatprep.subr.bf16.mxu1 %v549_v0 }
  0x5d   :  { %399 = vmatpush3.bf16.msra.mxu0 %v468_v10  ;;  %439 = vmatpush3.bf16.msra.mxu1 %v468_v10 }
  0x5e   :  { %400 = vmatprep.subr.bf16.mxu0 %v549_v0  ;;  %440 = vmatprep.subr.bf16.mxu1 %v549_v0 }
  0x61   :  { %401 = vmatpush3.bf16.msra.mxu0 %v469_v13  ;;  %441 = vmatpush3.bf16.msra.mxu1 %v469_v13 }
  0x62   :  { %402 = vmatprep.subr.bf16.mxu0 %v549_v0  ;;  %442 = vmatprep.subr.bf16.mxu1 %v549_v0 }
  0x65   :  { %403 = vmatpush3.bf16.msra.mxu0 %v470_v16  ;;  %443 = vmatpush3.bf16.msra.mxu1 %v470_v16 }
  0x68   :  { %405 = vmatmul.mubr.bf16.vlgmr.msra.gmra.mrb[0].mxu0 %v62_v8  ;;  %445 = vmatmul.mubr.bf16.vlgmr.msra.gmra.mrb[0].mxu1 %v196_v9 }
 0x13b   :  { %v188_v19 = vpop.f32.mrb[0].mxu0  ;;  %v274_v20 = vpop.f32.mrb[0].mxu1 }
 0x13c   :  { %v194_v21 = vmul.f32 0.03125, %v188_v19  ;;  %v406_v22 = vpop.f32.mrb[1].mxu0  ;;  %v446_v23 = vpop.f32.mrb[1].mxu1  ;;  %v280_v27 = vmul.f32 0.03125, %v274_v20 }
 0x13d   :  { %v191_v24 = vpop.f32.mrb[2].mxu0  ;;  %v277_v25 = vpop.f32.mrb[2].mxu1 }
 0x13e   :  { %v281_v26 = vmul.f32 %v194_v21, %v194_v21  ;;  %v407_v28 = vpop.f32.mrb[3].mxu0  ;;  %v447_v29 = vpop.f32.mrb[3].mxu1 }
 0x140   :  { %v282_v30 = vsub.f32 %v280_v27, %v281_v26 }
 0x142   :  { %v283_v31 = vmax.f32 %v282_v30, 0.0 }
 0x144   :  { %v284_v32 = vadd.f32 1e-05, %v283_v31 }
 0x146   :  { %471 = vrsqrt.f32 %v284_v32 }
 0x150   :  { %v472_v34 = vpop.eup %471 }
 0x151   :  { %v294_v35 = vmul.f32 %v472_v34, %v330_v33 }
 0x153   :  { %v296_v37 = vmul.f32 %v294_v35, %v194_v21  ;;  %v295_v38 = vmul.f32 %v294_v35, %v618_v5 }
 0x155   :  { %v303_v39 = vsub.f32 %v331_v36, %v296_v37 }
 0x157   :  { %v304_v40 = vadd.f32 %v303_v39, %v295_v38 }
 0x159   :  { %305 = vst [vmem:[#allocation7] sm:$0xf] %v304_v40 }
 0x15a   :  { %528 = shalt.err (!%p525_p6)
}
 0x15b   :  { %s529_s2 = scalar_lea.hbm %s678_s4, 64 }
 0x15c   :  { %p530_p7 = scmp.ne.s32.totalorder %s678_s4, %s529_s2  ;;  %p533_p8 = scmp.lt.u32.totalorder %s529_s2, %s678_s4 }
 0x15e   :  { %p535_p9 = pnand %p533_p8, %p530_p7 }
 0x160   :  { %538 = shalt.err (!%p535_p9)
}
 0x161   :  { %315 = dma.vmem_to_hbm [thread:$0]  %s313_s18, 64, %s678_s4, [#allocation4]  }
 0x162   :  { %543 = dma.done.wait [#allocation4], 64  }
 0x163   :  { %544 = vsyncadd [#allocation4], 4294967232 }
 0x164   :  { %319 = vsyncpa [#allocation3], 1 }
 0x165   :  { %320 = vsyncpa [#allocation6], 1 }
 0x166   :  { %321 = vsyncpa [#allocation4], 1 }

</bundles_post_ra>
